<compile_context>
chip_gen: v7x
topology: tpu7x:2x2x1
jax: 0.10.0
libtpu: 0.0.40
codegen_flags: <defaults>
</compile_context>

<pallas_src>
import functools

import jax
import jax.numpy as jnp
import numpy as np
from jax.experimental import pallas as pl
from jax.experimental.pallas import tpu as pltpu

_LANE = 128
_SUBLANE = 8
_INNER_ROWS = 512          # inner-chunk rows (bounds in-kernel live temps to ~256 KiB f32)


def _round_up(v, m):
    return ((v + m - 1) // m) * m


def _vmem_capacity_bytes():
    """Per-core VMEM capacity; conservative fallback if the query is unavailable."""
    try:
        return int(pltpu.get_tpu_info().vmem_capacity_bytes)
    except Exception:
        return 64 * 1024 * 1024     # v7x per-TC size: safe lower bound everywhere


def _sumsq_rows_kernel(x_ref, out_ref, *, rows_total, tr, inner):
    """Grid (B_eff, K); each step reduces a (1, tr, 128) chunk into out_ref.

    x_ref:   (1, tr, 128)  input chunk (VMEM)
    out_ref: (1, 8, 128)   per-(pseudo)batch partial sums — resident across K
    """
    k = pl.program_id(1)
    last = pl.num_programs(1) - 1
    n_inner = tr // inner

    @pl.when(k == 0)
    def _init():
        out_ref[...] = jnp.zeros_like(out_ref)

    def fold(xx):
        # (inner, 128) -> (8, 128): pure vreg-wise VPU adds (sublane fold).
        return jnp.sum(xx.reshape(inner // _SUBLANE, _SUBLANE, _LANE), axis=0)

    def accum(masked):
        def body(c, acc):
            start = pl.multiple_of(c * inner, _SUBLANE)
            xg = x_ref[0, pl.ds(start, inner), :].astype(jnp.float32)
            if masked:
                # Last k step only: rows past rows_total are OOB-padded by the
                # Pallas DMA; zero them before squaring.
                rem = rows_total - k * tr
                row = c * inner + jax.lax.broadcasted_iota(
                    jnp.int32, (inner, _LANE), 0)
                xg = jnp.where(row < rem, xg, 0.0)
            return acc + fold(xg * xg)
        return jax.lax.fori_loop(
            0, n_inner, body, jnp.zeros((_SUBLANE, _LANE), jnp.float32))

    if rows_total % tr != 0:
        @pl.when(k != last)
        def _bulk():
            out_ref[0] += accum(False)

        @pl.when(k == last)
        def _ragged():
            out_ref[0] += accum(True)
    else:
        out_ref[0] += accum(False)


def _sum_squares(x2d, *, block_bytes, vmem_cap):
    """Per-batch sum of squares of a (B, N) array.  Streaming Pallas reduction
    over the 128-aligned prefix; ragged tail (< 128 elems/batch) in plain JAX."""
    b, n = x2d.shape
    itemsize = jnp.dtype(x2d.dtype).itemsize
    gran = max(_SUBLANE, 32 // itemsize)      # 8 (f32), 16 (bf16), 32 (int8)
    rows = n // _LANE
    tail = n - rows * _LANE

    if rows < gran:
        # Tiny input (< gran*128 elements per batch): XLA handles it directly.
        return jnp.sum(x2d.astype(jnp.float32) ** 2, axis=1)

    # Optional 2-way split of the reduction range so a v7x megacore has at
    # least two balanced 'parallel' units when the batch is tiny or odd.
    nsplit = 1
    if (b <= 2 or b % 2 == 1) and rows % 2 == 0 and (rows // 2) >= gran:
        nsplit = 2
    b_eff = b * nsplit
    rows_k = rows // nsplit

    x_pref = x2d if tail == 0 else x2d[:, :rows * _LANE]
    x3 = x_pref.reshape(b_eff, rows_k, _LANE)           # free (row-major) reshape

    # Tile sizing: tr (block rows) is a multiple of `inner`, which is a
    # multiple of the dtype's sublane granularity.
    row_bytes = _LANE * itemsize
    tr_cap = max(gran, (block_bytes // row_bytes) // gran * gran)
    inner = max(gran, min(_INNER_ROWS, tr_cap, (rows_k // gran) * gran))
    tr = max(inner, min((tr_cap // inner) * inner, _round_up(rows_k, inner)))
    k_steps = pl.cdiv(rows_k, tr)

    vmem_limit = int(min(vmem_cap * 3 // 4,
                         max(2 * tr * row_bytes + (4 << 20), 16 << 20)))

    kernel = functools.partial(
        _sumsq_rows_kernel, rows_total=rows_k, tr=tr, inner=inner)
    partial = pl.pallas_call(
        kernel,
        out_shape=jax.ShapeDtypeStruct((b_eff, _SUBLANE, _LANE), jnp.float32),
        grid_spec=pltpu.PrefetchScalarGridSpec(
            num_scalar_prefetch=0,
            grid=(b_eff, k_steps),
            in_specs=[pl.BlockSpec((1, tr, _LANE), lambda bi, k: (bi, k, 0))],
            out_specs=pl.BlockSpec((1, _SUBLANE, _LANE), lambda bi, k: (bi, 0, 0)),
        ),
        compiler_params=pltpu.CompilerParams(
            dimension_semantics=("parallel", "arbitrary"),
            vmem_limit_bytes=vmem_limit,
        ),
    )(x3)

    kernel_sum = jnp.sum(partial.reshape(b, -1), axis=1)   # tiny final reduce in XLA
    if tail:
        tail_sum = jnp.sum(x2d[:, rows * _LANE:].astype(jnp.float32) ** 2, axis=1)
        return kernel_sum + tail_sum
    return kernel_sum


def detection_forward(x, model=None, *, compute_grad=True, threshold=0.0,
                      block_bytes=None):
    """Pallas equivalent of Detection.forward (energy detector).

    x: (n_batch, n_channels, signal_length); f32 or bf16 (bf16 halves HBM
       traffic; the kernel accumulates in f32).
    returns: (boolean flags (n_batch,), float32 scores (n_batch,))
    """
    # TODO(synk): `compute_grad` / `model` belong to the abstract Detection API
    # but have no effect for this canonical energy detector (no model response).
    del model, compute_grad

    b, c, l = x.shape
    n = c * l

    vmem_cap = _vmem_capacity_bytes()
    if block_bytes is None:
        block_bytes = min(16 << 20, vmem_cap // 4)
    block_bytes = min(block_bytes, vmem_cap // 4)   # never double-buffer past VMEM

    x2d = x.reshape(b, n)                           # free reshape, no copy
    sumsq = _sum_squares(x2d, block_bytes=block_bytes, vmem_cap=vmem_cap)
    scores = sumsq * jnp.float32(1.0 / n)           # mean energy
    flags = scores > jnp.float32(threshold)
    return flags, scores


if __name__ == "__main__":
    key = jax.random.PRNGKey(0)
    threshold = 0.9

    # Small shapes exercising every code path:
    cases = [
        ((2, 4, 256), jnp.float32, {}),                             # aligned, single step
        ((2, 4, 4096), jnp.float32, dict(block_bytes=8 * 1024)),    # multi-step reduction + 2-way split
        ((2, 3, 640), jnp.float32, {}),                             # ragged row count -> masked last block
        ((2, 4, 1000), jnp.float32, {}),                            # aligned prefix + ragged tail in JAX
        ((2, 4, 250), jnp.float32, {}),                             # tiny (rows < 8) -> pure-JAX path
        ((2, 4, 512), jnp.bfloat16, {}),                            # bf16 ingest (16-row tiles)
    ]

    for shape, dtype, kw in cases:
        key, sub = jax.random.split(key)
        x = jax.random.normal(sub, shape, dtype=jnp.float32).astype(dtype)

        flags, scores = detection_forward(x, threshold=threshold, **kw)
        flags, scores = jax.block_until_ready((flags, scores))

        # Pure-JAX reference check.
        ref_scores = jnp.mean(x.astype(jnp.float32) ** 2, axis=(1, 2))
        ref_flags = ref_scores > threshold
        assert scores.shape == (shape[0],) and flags.shape == (shape[0],)
        assert flags.dtype == jnp.bool_
        np.testing.assert_allclose(np.asarray(scores), np.asarray(ref_scores),
                                   rtol=1e-5, atol=1e-6)
        np.testing.assert_array_equal(np.asarray(flags), np.asarray(ref_flags))

    print("KERNEL_OK")
</pallas_src>

<mosaic_0001>
module attributes {stable_mosaic.version = 11 : i64} {
  func.func @_sumsq_rows_kernel(%arg0: i32, %arg1: i32, %arg2: memref<1x8x128xf32, #tpu.memory_space<vmem>>, %arg3: memref<1x8x128xf32, #tpu.memory_space<vmem>>) attributes {dimension_semantics = [#tpu.dimension_semantics<parallel>, #tpu.dimension_semantics<arbitrary>], iteration_bounds = array<i64: 2, 1>, scalar_prefetch = 0 : i64, scratch_operands = 0 : i64, tpu.core_type = #tpu.core_type<tc>, window_params = [{transform_indices = @transform_0, window_bounds = array<i64: 1, 8, 128>}, {transform_indices = @transform_1, window_bounds = array<i64: 1, 8, 128>}]} {
    %c0_i32 = arith.constant 0 : i32
    %0 = arith.cmpi eq, %arg1, %c0_i32 : i32
    %1 = arith.extui %0 : i1 to i32
    %c0_i32_0 = arith.constant 0 : i32
    %2 = arith.cmpi ne, %1, %c0_i32_0 : i32
    scf.if %2 {
      %cst_10 = arith.constant 0.000000e+00 : f32
      %19 = vector.broadcast %cst_10 : f32 to vector<1x8x128xf32>
      %c0_11 = arith.constant 0 : index
      %c0_12 = arith.constant 0 : index
      %c0_13 = arith.constant 0 : index
      %20 = vector.load %arg3[%c0_11, %c0_12, %c0_13] : memref<1x8x128xf32, #tpu.memory_space<vmem>>, vector<1x8x128xf32>
      tpu.vector_store %arg3[%c0_11, %c0_12, %c0_13], %19 {strides = array<i32>} : memref<1x8x128xf32, #tpu.memory_space<vmem>>, vector<1x8x128xf32>,
    } else {
    }
    %c0 = arith.constant 0 : index
    %c0_1 = arith.constant 0 : index
    %c0_2 = arith.constant 0 : index
    %3 = vector.load %arg3[%c0, %c0_1, %c0_2] : memref<1x8x128xf32, #tpu.memory_space<vmem>>, vector<1x8x128xf32>
    %4 = vector.shape_cast %3 : vector<1x8x128xf32> to vector<8x128xf32>
    %cst = arith.constant 0.000000e+00 : f32
    %5 = vector.broadcast %cst : f32 to vector<8x128xf32>
    %c0_i32_3 = arith.constant 0 : i32
    %c8_i32 = arith.constant 8 : i32
    %6 = arith.muli %c0_i32_3, %c8_i32 : i32
    %7 = tpu.assume_multiple %6, 8 : i32
    %c0_4 = arith.constant 0 : index
    %8 = arith.index_cast %7 : i32 to index
    %c0_5 = arith.constant 0 : index
    %9 = vector.load %arg2[%c0_4, %8, %c0_5] : memref<1x8x128xf32, #tpu.memory_space<vmem>>, vector<1x8x128xf32>
    %10 = vector.shape_cast %9 : vector<1x8x128xf32> to vector<8x128xf32>
    %11 = arith.mulf %10, %10 : vector<8x128xf32>
    %12 = vector.shape_cast %11 : vector<8x128xf32> to vector<1x8x128xf32>
    %cst_6 = arith.constant dense<0.000000e+00> : vector<8x128xf32>
    %13 = vector.multi_reduction <add>, %12, %cst_6 [0] : vector<1x8x128xf32> to vector<8x128xf32>
    %14 = arith.addf %5, %13 : vector<8x128xf32>
    %c1_i32 = arith.constant 1 : i32
    %15 = arith.addf %4, %14 : vector<8x128xf32>
    %c0_7 = arith.constant 0 : index
    %c0_8 = arith.constant 0 : index
    %c0_9 = arith.constant 0 : index
    %16 = vector.load %arg3[%c0_7, %c0_8, %c0_9] : memref<1x8x128xf32, #tpu.memory_space<vmem>>, vector<1x8x128xf32>
    %17 = vector.shape_cast %16 : vector<1x8x128xf32> to vector<8x128xf32>
    %18 = vector.shape_cast %15 : vector<8x128xf32> to vector<1x8x128xf32>
    tpu.vector_store %arg3[%c0_7, %c0_8, %c0_9], %18 {strides = array<i32>} : memref<1x8x128xf32, #tpu.memory_space<vmem>>, vector<1x8x128xf32>,
    return
  }
  func.func @transform_0(%arg0: i32, %arg1: i32) -> (i32, i32, i32) {
    %c0_i32 = arith.constant 0 : i32
    %c0_i32_0 = arith.constant 0 : i32
    return %arg0, %arg1, %c0_i32 : i32, i32, i32
  }
  func.func @transform_1(%arg0: i32, %arg1: i32) -> (i32, i32, i32) {
    %c0_i32 = arith.constant 0 : i32
    %c0_i32_0 = arith.constant 0 : i32
    %c0_i32_1 = arith.constant 0 : i32
    return %arg0, %c0_i32, %c0_i32_0 : i32, i32, i32
  }
}

</mosaic_0001>

<bundles_post_ra>
// kernel: tpu_custom_call.1
= control target key start
LH: loop header
LB: loop body
LE: loop exit
PB: predicated region body
PF: predicated region fallthrough
CT: control target
= control target key end

     0   :  { %6 = vsyncpa [#allocation3], 0  ;;  %s626_s0 = inlined_call_operand.hbm [shape: f32[2,8,128], index: 0, kind: input, shape index: {}]   ;;  %s627_s1 = inlined_call_operand.hbm [shape: f32[2,8,128], index: 1, kind: output, shape index: {}]  }
   0x1   :  { %8 = vsyncpa [#allocation3 + $0x1], 0 }
   0x2   :  { %9 = vsyncpa [#allocation4], 0 }
   0x3   :  { %11 = vsyncpa [#allocation4 + $0x1], 0  ;;  %s454_s6 = smov 0   ;;  %s456_s7 = smov 0  }
   0x4   :  { %s458_s8 = smov 0   ;;  %s460_s9 = smov 0  }
   0x5   :  { %s462_s10 = smov 0   ;;  %s464_s11 = smov 0  }
   0x6 LB: > { %s252_s12 = sadd.s32 4294967295, %s440_s11   ;;  %s253_s13 = sadd.s32 4294967294, %s440_s11   ;;  %s440_s11 = sphi %s464_s11, %s17_s11   ;;  %s436_s10 = sphi %s462_s10, %s643_s10   ;;  %s432_s9 = sphi %s460_s9, %s642_s9   ;;  %s428_s8 = sphi %s458_s8, %s641_s8   ;;  %s424_s7 = sphi %s456_s7, %s640_s7   ;;  %s420_s6 = sphi %s454_s6, %s639_s6  }
   0x7   : > { %s29_s14 = sadd.s32 1, %s436_s10  ;;  %s38_s15 = sadd.s32 1, %s428_s8 }
   0x8   : > { %p31_p0 = scmp.ge.s32.totalorder %s29_s14, 2  ;;  %p45_p1 = scmp.ne.s32.totalorder %s428_s8, %s424_s7 }
   0x9   : > { %p46_p2 = scmp.eq.s32.totalorder %s440_s11, 0  ;;  %p51_p3 = scmp.ne.s32.totalorder %s424_s7, %s420_s6 }
   0xa   : > { %s645_s14 = smov (%p31_p0, %s29_s14), 0  ;;  %p52_p5 = scmp.eq.s32.totalorder %s252_s12, 0 }
   0xb   : > { %p495_p4 = por %p46_p2, %p45_p1  ;;  %s33_s17 = ssub.s32 %s436_s10, %s645_s14 }
   0xc   : > { %p75_p6 = scmp.eq.s32.totalorder %s252_s12, 1  ;;  %p36_p7 = scmp.eq.s32.totalorder %s33_s17, 0 }
   0xd   : > { %p501_p8 = por %p52_p5, %p51_p3  ;;  %p81_p10 = scmp.eq.s32.totalorder %s253_s13, 1 }
   0xe   : > { %p505_p9 = por %p75_p6, %p45_p1  ;;  %p277_p13 = scmp.lt.s32.totalorder %s440_s11, 2 }
   0xf   : > { %s510_s20 = scalar_select %p36_p7, %s428_s8, %s38_s15  }
  0x10   : > { %s631_s19 = scalar_select %p505_p9, 1, 0 }
  0x11   : > { %p512_p11 = por %p81_p10, %p51_p3  ;;  %s101_s22 = sand.u32 1, %s428_s8  }
  0x12   : > { %s256_s23 = sshll.u32 %s101_s22, 3  ;;  %s257_s24 = sshll.u32 %s436_s10, 7 }
  0x13   : > { %s632_s21 = scalar_select %p512_p11, 1, 0 }
  0x14   : > { %s523_s27 = scalar_lea.hbm %s626_s0, %s257_s24  ;;  %s105_s28 = scalar_lea.vmem [#allocation2], %s256_s23 }
  0x15   : > { %s113_s29 = sshll.u32 %s105_s28, 4  ;;  %p529_p0 = pnand %p277_p13, %p495_p4  ;;  %s525_s29 = int_to_ptr.vmem [resolvable:$true] %s113_s29 }
  0x16   : > { %s102_s2 = scalar_lea.sflag [#allocation3], %s101_s22  ;;  %s328_s3 = scalar_lea.hbm %s523_s27, 128 }
  0x17   : > { %p329_p3 = scmp.ne.s32.totalorder %s523_s27, %s328_s3  ;;  %p330_p5 = pneg %p529_p0 }
  0x18   : > { %s333_s12 = scalar_lea.hbm %s626_s0, 256  ;;  %p334_p4 = scmp.lt.u32.totalorder %s523_s27, %s626_s0 }
  0x19   : > { %p331_p6 = pnand %p330_p5, %p329_p3  ;;  %p335_p10 = scmp.lt.u32.totalorder %s333_s12, %s328_s3 }
  0x1a   : > { %p337_p12 = scmp.lt.u32.totalorder %s328_s3, %s523_s27 }
  0x1b   : > { %p332_p7 = pneg %p331_p6  ;;  %p336_p13 = por %p335_p10, %p334_p4 }
  0x1d   : > { %p338_p1 = por %p337_p12, %p336_p13 }
  0x1f   : > { %p339_p2 = pnand %p338_p1, %p332_p7 }
  0x21   : > { %342 = shalt.err (!%p339_p2)
}
  0x22   : > { %s343_s16 = scalar_lea.vmem %s525_s29, 128  ;;  %s442_s17 = smov [#allocation2]  }
  0x23   : > { %p344_p3 = scmp.ne.s32.totalorder %s525_s29, %s343_s16  ;;  %s348_s22 = sshll.u32 %s442_s17, 4  ;;  %s349_s22 = int_to_ptr.vmem [resolvable:$false] %s348_s22 }
  0x24   : > { %s350_s23 = scalar_lea.vmem %s349_s22, 256  ;;  %p351_p9 = scmp.lt.s32.totalorder %s525_s29, %s349_s22 }
  0x25   : > { %p346_p6 = pnand %p344_p3, %p330_p5  ;;  %p352_p4 = scmp.lt.s32.totalorder %s350_s23, %s343_s16 }
  0x27   : > { %p347_p11 = pneg %p346_p6  ;;  %p353_p10 = por %p352_p4, %p351_p9 }
  0x29   : > { %p354_p12 = pnand %p353_p10, %p347_p11 }
  0x2b   : > { %357 = shalt.err (!%p354_p12)
}
  0x2c   : > { %272 = dma.hbm_to_vmem [thread:$0]  (!%p529_p0), %s523_s27, 128, %s525_s29, %s102_s2  }
  0x2d   : > { %p634_p1 = scmp.lt.s32.totalorder %s440_s11, 3  ;;  %p635_p2 = scmp.ge.s32.totalorder %s440_s11, 1 }
  0x2f   : > { %p119_p5 = pnand %p635_p2, %p634_p1 }
  0x30   : > { %s565_s24 = sand.u32 (!%p119_p5), 1, %s424_s7  }
  0x31   : > { %122 = sbr.rel (%p119_p5) target bundleno = 83 (0x53), region = 24  ;;  %s259_s25 = sshll.u32 (!%p119_p5), %s565_s24, 3 }
  0x32   : > { %s125_s26 = scalar_lea.sflag (!%p119_p5), [#allocation3], %s565_s24  ;;  %s128_s28 = scalar_lea.vmem (!%p119_p5), [#allocation2], %s259_s25 }
  0x38   : > { %411 = dma.done.wait (%p501_p8), %s125_s26, 128  }
  0x39   : > { %413 = vsyncadd (%p501_p8), %s125_s26, 4294967168  ;;  %v153_v0 = vld [vmem:[%s128_s28] sm:$0xff]  ;;  %s262_s27 = sshll.u32 %s432_s9, 7  ;;  %s146_s29 = scalar_lea.vmem [#allocation5], %s259_s25 }
  0x3a   : > { %s173_s30 = sshll.u32 %s146_s29, 4  ;;  %v154_v1 = vmul.f32 %v153_v0, %v153_v0  ;;  %s577_s4 = scalar_lea.hbm %s627_s1, %s262_s27  ;;  %s579_s30 = int_to_ptr.vmem [resolvable:$true] %s173_s30 }
  0x3b   : > { %s160_s18 = scalar_lea.sflag [#allocation4], %s565_s24  ;;  %s358_s5 = scalar_lea.vmem %s579_s30, 128 }
  0x3c   : > { %158 = vst [vmem:[%s146_s29] sm:$0xff] %v154_v1  ;;  %p359_p8 = scmp.ne.s32.totalorder %s579_s30, %s358_s5  ;;  %p636_p9 = scmp.ne.s32.totalorder %s631_s19, 0 }
  0x3d   : > { %s443_s9 = smov [#allocation5]  }
  0x3e   : > { %p360_p11 = pnand %p359_p8, %p636_p9  ;;  %s362_s12 = sshll.u32 %s443_s9, 4  ;;  %s363_s12 = int_to_ptr.vmem [resolvable:$false] %s362_s12 }
  0x3f   : > { %s364_s13 = scalar_lea.vmem %s363_s12, 256  ;;  %p365_p7 = scmp.lt.s32.totalorder %s579_s30, %s363_s12 }
  0x40   : > { %p361_p0 = pneg %p360_p11  ;;  %p366_p13 = scmp.lt.s32.totalorder %s364_s13, %s358_s5 }
  0x42   : > { %p367_p3 = por %p366_p13, %p365_p7 }
  0x44   : > { %p368_p6 = pnand %p367_p3, %p361_p0 }
  0x46   : > { %371 = shalt.err (!%p368_p6)
}
  0x47   : > { %s372_s15 = scalar_lea.hbm %s577_s4, 128  ;;  %s376_s22 = scalar_lea.hbm %s627_s1, 256 }
  0x48   : > { %p373_p4 = scmp.ne.s32.totalorder %s577_s4, %s372_s15  ;;  %p377_p1 = scmp.lt.u32.totalorder %s577_s4, %s627_s1 }
  0x49   : > { %p378_p2 = scmp.lt.u32.totalorder %s376_s22, %s372_s15  ;;  %p380_p8 = scmp.lt.u32.totalorder %s372_s15, %s577_s4 }
  0x4a   : > { %p374_p10 = pnand %p373_p4, %p636_p9 }
  0x4b   : > { %p379_p5 = por %p378_p2, %p377_p1 }
  0x4c   : > { %p375_p12 = pneg %p374_p10 }
  0x4d   : > { %p381_p11 = por %p380_p8, %p379_p5 }
  0x4f   : > { %p382_p0 = pnand %p381_p11, %p375_p12 }
  0x51   : > { %385 = shalt.err (!%p382_p0)
}
  0x52   : > { %267 = dma.vmem_to_hbm [thread:$0]  (%p636_p9), %s579_s30, 128, %s577_s4, %s160_s18  }
  0x53 PF: > { %s185_s25 = sand.u32 1, %s420_s6   ;;  %p637_p7 = scmp.ne.s32.totalorder %s632_s21, 0 }
  0x54   : > { %p638_p13 = scmp.ge.s32.totalorder %s440_s11, 2  ;;  %s186_s26 = scalar_lea.sflag [#allocation4], %s185_s25 }
  0x56   : > { %p274_p3 = pnand %p638_p13, %p637_p7 }
  0x58   : > { %415 = dma.done.wait (!%p274_p3), %s186_s26, 128  }
  0x59   : > { %417 = vsyncadd (!%p274_p3), %s186_s26, 4294967168  ;;  %s17_s11 = sadd.s32 1, %s440_s11   ;;  %s639_s6 = smov %s424_s7 }
  0x5a   : > { %p14_p6 = scmp.ge.s32.totalorder %s17_s11, 4   ;;  %s640_s7 = smov %s428_s8 }
  0x5b   : > { %s641_s8 = smov %s510_s20  ;;  %s642_s9 = smov %s436_s10 }
  0x5c   : > { %s643_s10 = smov %s645_s14  ;;  %16 = sbr.rel (!%p14_p6) target bundleno = 6 (0x6), region = 73 }
  0x63   :  { %191 = vsyncpa [#allocation3], 1 }
  0x64   :  { %193 = vsyncpa [#allocation3 + $0x1], 1 }
  0x65   :  { %194 = vsyncpa [#allocation4], 1 }
  0x66   :  { %196 = vsyncpa [#allocation4 + $0x1], 1 }

</bundles_post_ra>
